<compile_context>
chip_gen: v6e
topology: v6e:2x2x1
jax: 0.10.0
libtpu: 0.0.40
codegen_flags: <defaults>
</compile_context>

<pallas_src>
import functools

import jax
import jax.numpy as jnp
from jax.experimental import pallas as pl
from jax.experimental.pallas import tpu as pltpu


# ----------------------------- fused Pallas kernel --------------------------
def _fused_kernel(x_ref, w1_ref, b1_ref, w2_ref, b2_ref, w3_ref, b3_ref,
                  o_ref, h1_ref, h2_ref, *, H1, H2, H3):
    """One block of TN fused (batch*depth) slices; all three layers fused.

    x_ref : (H1, TN, 2*W*Cin)   layer-1 H taps pre-folded into the lane/K axis
    w1_ref: (2*W*Cin, W*P)      banded conv1 weights, BN scale folded, taps stacked
    w2_ref: (4, W*P, W*P)       per-H-tap banded conv2 weights
    w3_ref: (2, W*P, W3*P)      per-H-tap banded conv3 weights (stride-2 W)
    bK_ref: (1, cols)           folded conv-bias + BatchNorm bias
    o_ref : (H3, TN, W3*P)
    h1_ref: (4, H2, TN, W*P)    VMEM scratch, tap-major (layer-1 activations)
    h2_ref: (H2, TN, W*P)       VMEM scratch (layer-2 activations)
    """
    tn = o_ref.shape[1]
    c1 = w1_ref.shape[-1]          # W * planes
    c3 = w3_ref.shape[-1]          # W3 * planes

    # ---- layer 1: ONE matmul, M = H1*TN, K = 2*W*Cin (taps folded) ----------
    x2d = x_ref[...].reshape(H1 * tn, x_ref.shape[-1])
    a1 = jnp.dot(x2d, w1_ref[...], preferred_element_type=jnp.float32)
    a1 = jnp.maximum(a1 + b1_ref[...], 0.0).reshape(H2, 4, tn, c1)
    for g in range(4):             # stage tap-major in VMEM (bounds vreg lives)
        h1_ref[g] = a1[:, g]

    # ---- layer 2: 4 weight-stationary tap matmuls, M = H2*TN ----------------
    acc2 = jnp.dot(h1_ref[0].reshape(H2 * tn, c1), w2_ref[0],
                   preferred_element_type=jnp.float32)
    for g in range(1, 4):
        acc2 = acc2 + jnp.dot(h1_ref[g].reshape(H2 * tn, c1), w2_ref[g],
                              preferred_element_type=jnp.float32)
    h2_ref[...] = jnp.maximum(acc2 + b2_ref[...], 0.0).reshape(H2, tn, c1)

    # ---- layer 3: 2 tap matmuls over shifted H views, M = H3*TN -------------
    acc3 = jnp.dot(h2_ref[pl.ds(0, H3)].reshape(H3 * tn, c1), w3_ref[0],
                   preferred_element_type=jnp.float32)
    acc3 = acc3 + jnp.dot(h2_ref[pl.ds(1, H3)].reshape(H3 * tn, c1), w3_ref[1],
                          preferred_element_type=jnp.float32)
    out = jnp.maximum(acc3 + b3_ref[...], 0.0)
    o_ref[...] = out.reshape(H3, tn, c3).astype(o_ref.dtype)   # single store


# ----------------------------- wrapper-side repack --------------------------
def _unfold_w_layer(w, conv_b, gamma, beta, mean, var, *, w_in, w_out, sw,
                    eps=1e-5):
    """Pack a Conv3d weight (C_out, C_in, 1, KH, 3) (stride sw, pad 1 along W)
    into KH banded matrices (w_in*C_in, w_out*C_out) with the BatchNorm scale
    folded into the columns.  Returns (Wb, bias) with bias shape (1, w_out*C_out).
    """
    c_out, c_in, _, kh, kw = w.shape
    wt = jnp.transpose(w[:, :, 0], (2, 3, 1, 0))            # (KH, KW, C_in, C_out)

    qi = jnp.arange(w_in)[:, None]
    qo = jnp.arange(w_out)[None, :]
    tap = qi - qo * sw + 1                                   # pad = 1 along W
    valid = ((tap >= 0) & (tap < kw)).astype(w.dtype)        # (w_in, w_out)
    tap = jnp.clip(tap, 0, kw - 1)

    band = wt[:, tap] * valid[None, :, :, None, None]        # (KH, w_in, w_out, C_in, C_out)

    s = gamma / jnp.sqrt(var + eps)                          # BN scale
    b = (conv_b - mean) * s + beta                           # folded bias
    band = band * s[None, None, None, None, :]

    wb = jnp.transpose(band, (0, 1, 3, 2, 4)).reshape(
        kh, w_in * c_in, w_out * c_out)
    bias = jnp.tile(b, w_out)[None, :]                       # (1, w_out*C_out)
    return wb, bias


def _pick_block_n(n, per_row_bytes, *, vmem_budget=8 << 20, max_rows=512):
    """Largest sublane(8)-aligned block of fused batch*depth rows that fits the
    VMEM budget; for N >= 16 keep >= 2 grid steps so both v7x TCs get work."""
    tn = min(max_rows, max(8, vmem_budget // max(per_row_bytes, 1)))
    if n >= 16:
        tn = min(tn, n // 2)
    tn = min(tn, n)
    return max(8, (tn // 8) * 8)


def merge_sensor_block_forward(x, params, eps=1e-5):
    """x: (B, C_in, D, H, W)  (PyTorch NCDHW).  Returns (B, planes, D, H3, W3)."""
    B, C_in, D, H, W = x.shape
    P = params["w1"].shape[0]
    N = B * D

    # conv output extents (depth is pointwise for all three convs)
    H1 = (H - 2) // 2 + 1
    H2 = (H1 - 4) // 4 + 1
    H3 = H2 - 1
    W3 = (W - 1) // 2 + 1
    if H2 < 2:
        raise ValueError(f"H={H} too small for this block: need H2 >= 2 "
                         f"(effectively H >= 16), got H2={H2}")

    H1u = 4 * H2          # layer-1 rows actually consumed by layer 2
    Hu = 2 * H1u          # input H rows actually consumed by layer 1

    # NCDHW -> (H1u, N, 2*W*C_in): fold layer-1's two H taps into the lane axis.
    xl = x[:, :, :, :Hu, :].reshape(B, C_in, D, H1u, 2, W)
    xl = jnp.transpose(xl, (3, 0, 2, 4, 5, 1)).reshape(H1u, N, 2 * W * C_in)

    # banded, BN-folded weights (cheap one-time wrapper-side repack)
    w1b, b1f = _unfold_w_layer(params["w1"], params["b1"], params["g1"],
                               params["bt1"], params["m1"], params["v1"],
                               w_in=W, w_out=W, sw=1, eps=eps)
    w1b = w1b.reshape(2 * W * C_in, W * P)        # KH taps stacked along rows
    w2b, b2f = _unfold_w_layer(params["w2"], params["b2"], params["g2"],
                               params["bt2"], params["m2"], params["v2"],
                               w_in=W, w_out=W, sw=1, eps=eps)
    w3b, b3f = _unfold_w_layer(params["w3"], params["b3"], params["g3"],
                               params["bt3"], params["m3"], params["v3"],
                               w_in=W, w_out=W3, sw=2, eps=eps)

    # VMEM bytes per TN-row: double-buffered input + output blocks + scratch (f32)
    per_row = 4 * (2 * H1u * 2 * W * C_in        # input block x2
                   + 2 * H3 * W3 * P             # output block x2
                   + 4 * H2 * W * P              # h1 scratch
                   + H2 * W * P)                 # h2 scratch
    TN = _pick_block_n(N, per_row)
    Npad = -(-N // TN) * TN
    if Npad != N:
        xl = jnp.pad(xl, ((0, 0), (0, Npad - N), (0, 0)))
    grid = (Npad // TN,)

    weight_bytes = 4 * (w1b.size + w2b.size + w3b.size
                        + b1f.size + b2f.size + b3f.size)
    vmem_limit = int(min(max(2 * (per_row * TN + weight_bytes), 4 << 20),
                         32 << 20))

    flops = 2 * Npad * (H1u * (2 * W * C_in) * (W * P)
                        + H2 * 4 * (W * P) * (W * P)
                        + H3 * 2 * (W * P) * (W3 * P))
    bytes_accessed = 4 * (xl.size + Npad * H3 * W3 * P) + weight_bytes

    kernel = functools.partial(_fused_kernel, H1=H1u, H2=H2, H3=H3)

    out = pl.pallas_call(
        kernel,
        out_shape=jax.ShapeDtypeStruct((H3, Npad, W3 * P), jnp.float32),
        grid=grid,
        in_specs=[
            pl.BlockSpec((H1u, TN, 2 * W * C_in), lambda n: (0, n, 0)),
            pl.BlockSpec(w1b.shape, lambda n: (0, 0)),
            pl.BlockSpec(b1f.shape, lambda n: (0, 0)),
            pl.BlockSpec(w2b.shape, lambda n: (0, 0, 0)),
            pl.BlockSpec(b2f.shape, lambda n: (0, 0)),
            pl.BlockSpec(w3b.shape, lambda n: (0, 0, 0)),
            pl.BlockSpec(b3f.shape, lambda n: (0, 0)),
        ],
        out_specs=pl.BlockSpec((H3, TN, W3 * P), lambda n: (0, n, 0)),
        scratch_shapes=[
            pltpu.VMEM((4, H2, TN, W * P), jnp.float32),
            pltpu.VMEM((H2, TN, W * P), jnp.float32),
        ],
        compiler_params=pltpu.CompilerParams(
            dimension_semantics=("parallel",),
            vmem_limit_bytes=vmem_limit),
        cost_estimate=pl.CostEstimate(flops=flops, transcendentals=0,
                                      bytes_accessed=bytes_accessed),
    )(xl, w1b, b1f, w2b, b2f, w3b, b3f)

    # (H3, Npad, W3*planes) -> drop padding -> NCDHW
    out = out[:, :N].reshape(H3, B, D, W3, P)
    return jnp.transpose(out, (1, 4, 2, 0, 3))


# ----------------------- reference (plain JAX / XLA) ------------------------
def ref_forward(x, params, eps=1e-5):
    def layer(x, w, b, g, bt, m, v, stride, pad):
        y = jax.lax.conv_general_dilated(
            x, w, window_strides=stride, padding=pad,
            dimension_numbers=("NCDHW", "OIDHW", "NCDHW"))
        y = y + b[None, :, None, None, None]
        y = (y - m[None, :, None, None, None]) / jnp.sqrt(
            v + eps)[None, :, None, None, None]
        y = y * g[None, :, None, None, None] + bt[None, :, None, None, None]
        return jnp.maximum(y, 0.0)

    y = layer(x, params["w1"], params["b1"], params["g1"], params["bt1"],
              params["m1"], params["v1"], (1, 2, 1), [(0, 0), (0, 0), (1, 1)])
    y = layer(y, params["w2"], params["b2"], params["g2"], params["bt2"],
              params["m2"], params["v2"], (1, 4, 1), [(0, 0), (0, 0), (1, 1)])
    y = layer(y, params["w3"], params["b3"], params["g3"], params["bt3"],
              params["m3"], params["v3"], (1, 1, 2), [(0, 0), (0, 0), (1, 1)])
    return y


# ----------------------- deterministic parameter init -----------------------
def init_params(key, in_planes, planes):
    keys = jax.random.split(key, 9)

    def conv_init(k, cin, cout, kh, kw):
        k1, k2 = jax.random.split(k)
        fan_in = cin * 1 * kh * kw
        bound = 1.0 / (fan_in ** 0.5)
        w = jax.random.uniform(k1, (cout, cin, 1, kh, kw), jnp.float32,
                               -bound, bound)
        b = jax.random.uniform(k2, (cout,), jnp.float32, -bound, bound)
        return w, b

    def bn_init(k, c):
        k1, k2, k3, k4 = jax.random.split(k, 4)
        gamma = jax.random.uniform(k1, (c,), jnp.float32, 0.5, 1.5)
        beta = 0.2 * jax.random.normal(k2, (c,), jnp.float32)
        mean = 0.1 * jax.random.normal(k3, (c,), jnp.float32)
        var = jax.random.uniform(k4, (c,), jnp.float32, 0.5, 1.5)
        return gamma, beta, mean, var

    p = {}
    p["w1"], p["b1"] = conv_init(keys[0], in_planes, planes, 2, 3)
    p["g1"], p["bt1"], p["m1"], p["v1"] = bn_init(keys[1], planes)
    p["w2"], p["b2"] = conv_init(keys[2], planes, planes, 4, 3)
    p["g2"], p["bt2"], p["m2"], p["v2"] = bn_init(keys[3], planes)
    p["w3"], p["b3"] = conv_init(keys[4], planes, planes, 2, 3)
    p["g3"], p["bt3"], p["m3"], p["v3"] = bn_init(keys[5], planes)
    return p


if __name__ == "__main__":
    in_planes, planes = 4, 8
    B, D, H, W = 2, 4, 16, 8     # H must be >= 16 so conv3's H window fits

    key = jax.random.PRNGKey(0)
    kparams, kx = jax.random.split(key)
    params = init_params(kparams, in_planes, planes)
    x = jax.random.normal(kx, (B, in_planes, D, H, W), jnp.float32)

    out = merge_sensor_block_forward(x, params)
    out = jax.block_until_ready(out)

    ref = ref_forward(x, params)
    assert out.shape == ref.shape == (B, planes, D, 1, 4), (out.shape, ref.shape)
    max_err = float(jnp.max(jnp.abs(out - ref)))
    assert max_err < 1e-4, f"max abs err too large: {max_err}"

    print("KERNEL_OK")
</pallas_src>

<mosaic_0001>
module attributes {stable_mosaic.version = 11 : i64} {
  func.func @_fused_kernel(%arg0: i32, %arg1: memref<8x8x64xf32, #tpu.memory_space<vmem>>, %arg2: memref<64x64xf32, #tpu.memory_space<vmem>>, %arg3: memref<1x64xf32, #tpu.memory_space<vmem>>, %arg4: memref<4x64x64xf32, #tpu.memory_space<vmem>>, %arg5: memref<1x64xf32, #tpu.memory_space<vmem>>, %arg6: memref<2x64x32xf32, #tpu.memory_space<vmem>>, %arg7: memref<1x32xf32, #tpu.memory_space<vmem>>, %arg8: memref<1x8x32xf32, #tpu.memory_space<vmem>>, %arg9: memref<4x2x8x64xf32, #tpu.memory_space<vmem>>, %arg10: memref<2x8x64xf32, #tpu.memory_space<vmem>>) attributes {dimension_semantics = [#tpu.dimension_semantics<parallel>], iteration_bounds = array<i64: 1>, scalar_prefetch = 0 : i64, scratch_operands = 2 : i64, tpu.core_type = #tpu.core_type<tc>, window_params = [{transform_indices = @transform_0, window_bounds = array<i64: 8, 8, 64>}, {pipeline_mode = #tpu.pipeline_mode<synchronous>, transform_indices = @transform_1, window_bounds = array<i64: 64, 64>}, {pipeline_mode = #tpu.pipeline_mode<synchronous>, transform_indices = @transform_2, window_bounds = array<i64: 1, 64>}, {pipeline_mode = #tpu.pipeline_mode<synchronous>, transform_indices = @transform_3, window_bounds = array<i64: 4, 64, 64>}, {pipeline_mode = #tpu.pipeline_mode<synchronous>, transform_indices = @transform_4, window_bounds = array<i64: 1, 64>}, {pipeline_mode = #tpu.pipeline_mode<synchronous>, transform_indices = @transform_5, window_bounds = array<i64: 2, 64, 32>}, {pipeline_mode = #tpu.pipeline_mode<synchronous>, transform_indices = @transform_6, window_bounds = array<i64: 1, 32>}, {transform_indices = @transform_7, window_bounds = array<i64: 1, 8, 32>}]} {
    %c0 = arith.constant 0 : index
    %c0_0 = arith.constant 0 : index
    %c0_1 = arith.constant 0 : index
    %0 = vector.load %arg1[%c0, %c0_0, %c0_1] : memref<8x8x64xf32, #tpu.memory_space<vmem>>, vector<8x8x64xf32>
    %1 = vector.shape_cast %0 : vector<8x8x64xf32> to vector<64x64xf32>
    %c0_2 = arith.constant 0 : index
    %c0_3 = arith.constant 0 : index
    %2 = vector.load %arg2[%c0_2, %c0_3] : memref<64x64xf32, #tpu.memory_space<vmem>>, vector<64x64xf32>
    %cst = arith.constant dense<0.000000e+00> : vector<64x64xf32>
    %3 = tpu.matmul %1, %2, %cst {dimension_numbers = #tpu.dot_dimension_numbers<[1], [0], [0], [1], [0, 0, 1, 1], [], []>} : vector<64x64xf32>, vector<64x64xf32>, vector<64x64xf32> -> vector<64x64xf32>
    %c0_4 = arith.constant 0 : index
    %c0_5 = arith.constant 0 : index
    %4 = vector.load %arg3[%c0_4, %c0_5] : memref<1x64xf32, #tpu.memory_space<vmem>>, vector<1x64xf32>
    %5 = vector.broadcast %4 : vector<1x64xf32> to vector<64x64xf32>
    %6 = arith.addf %3, %5 : vector<64x64xf32>
    %cst_6 = arith.constant 0.000000e+00 : f32
    %7 = vector.broadcast %cst_6 : f32 to vector<64x64xf32>
    %8 = arith.maximumf %6, %7 : vector<64x64xf32>
    %9 = vector.shape_cast %8 : vector<64x64xf32> to vector<2x4x8x64xf32>
    %10 = vector.extract_strided_slice %9 {offsets = [0, 0, 0, 0], sizes = [2, 1, 8, 64], strides = [1, 1, 1, 1]} : vector<2x4x8x64xf32> to vector<2x1x8x64xf32>
    %11 = vector.shape_cast %10 : vector<2x1x8x64xf32> to vector<2x8x64xf32>
    %c0_7 = arith.constant 0 : index
    %c0_8 = arith.constant 0 : index
    %c0_9 = arith.constant 0 : index
    %c0_10 = arith.constant 0 : index
    %12 = vector.load %arg9[%c0_7, %c0_8, %c0_9, %c0_10] : memref<4x2x8x64xf32, #tpu.memory_space<vmem>>, vector<1x2x8x64xf32>
    %13 = vector.shape_cast %12 : vector<1x2x8x64xf32> to vector<2x8x64xf32>
    %14 = vector.shape_cast %11 : vector<2x8x64xf32> to vector<1x2x8x64xf32>
    tpu.vector_store %arg9[%c0_7, %c0_8, %c0_9, %c0_10], %14 {strides = array<i32>} : memref<4x2x8x64xf32, #tpu.memory_space<vmem>>, vector<1x2x8x64xf32>,
    %15 = vector.extract_strided_slice %9 {offsets = [0, 1, 0, 0], sizes = [2, 1, 8, 64], strides = [1, 1, 1, 1]} : vector<2x4x8x64xf32> to vector<2x1x8x64xf32>
    %16 = vector.shape_cast %15 : vector<2x1x8x64xf32> to vector<2x8x64xf32>
    %c1 = arith.constant 1 : index
    %c0_11 = arith.constant 0 : index
    %c0_12 = arith.constant 0 : index
    %c0_13 = arith.constant 0 : index
    %17 = vector.load %arg9[%c1, %c0_11, %c0_12, %c0_13] : memref<4x2x8x64xf32, #tpu.memory_space<vmem>>, vector<1x2x8x64xf32>
    %18 = vector.shape_cast %17 : vector<1x2x8x64xf32> to vector<2x8x64xf32>
    %19 = vector.shape_cast %16 : vector<2x8x64xf32> to vector<1x2x8x64xf32>
    tpu.vector_store %arg9[%c1, %c0_11, %c0_12, %c0_13], %19 {strides = array<i32>} : memref<4x2x8x64xf32, #tpu.memory_space<vmem>>, vector<1x2x8x64xf32>,
    %20 = vector.extract_strided_slice %9 {offsets = [0, 2, 0, 0], sizes = [2, 1, 8, 64], strides = [1, 1, 1, 1]} : vector<2x4x8x64xf32> to vector<2x1x8x64xf32>
    %21 = vector.shape_cast %20 : vector<2x1x8x64xf32> to vector<2x8x64xf32>
    %c2 = arith.constant 2 : index
    %c0_14 = arith.constant 0 : index
    %c0_15 = arith.constant 0 : index
    %c0_16 = arith.constant 0 : index
    %22 = vector.load %arg9[%c2, %c0_14, %c0_15, %c0_16] : memref<4x2x8x64xf32, #tpu.memory_space<vmem>>, vector<1x2x8x64xf32>
    %23 = vector.shape_cast %22 : vector<1x2x8x64xf32> to vector<2x8x64xf32>
    %24 = vector.shape_cast %21 : vector<2x8x64xf32> to vector<1x2x8x64xf32>
    tpu.vector_store %arg9[%c2, %c0_14, %c0_15, %c0_16], %24 {strides = array<i32>} : memref<4x2x8x64xf32, #tpu.memory_space<vmem>>, vector<1x2x8x64xf32>,
    %25 = vector.extract_strided_slice %9 {offsets = [0, 3, 0, 0], sizes = [2, 1, 8, 64], strides = [1, 1, 1, 1]} : vector<2x4x8x64xf32> to vector<2x1x8x64xf32>
    %26 = vector.shape_cast %25 : vector<2x1x8x64xf32> to vector<2x8x64xf32>
    %c3 = arith.constant 3 : index
    %c0_17 = arith.constant 0 : index
    %c0_18 = arith.constant 0 : index
    %c0_19 = arith.constant 0 : index
    %27 = vector.load %arg9[%c3, %c0_17, %c0_18, %c0_19] : memref<4x2x8x64xf32, #tpu.memory_space<vmem>>, vector<1x2x8x64xf32>
    %28 = vector.shape_cast %27 : vector<1x2x8x64xf32> to vector<2x8x64xf32>
    %29 = vector.shape_cast %26 : vector<2x8x64xf32> to vector<1x2x8x64xf32>
    tpu.vector_store %arg9[%c3, %c0_17, %c0_18, %c0_19], %29 {strides = array<i32>} : memref<4x2x8x64xf32, #tpu.memory_space<vmem>>, vector<1x2x8x64xf32>,
    %c0_20 = arith.constant 0 : index
    %c0_21 = arith.constant 0 : index
    %c0_22 = arith.constant 0 : index
    %c0_23 = arith.constant 0 : index
    %30 = vector.load %arg9[%c0_20, %c0_21, %c0_22, %c0_23] : memref<4x2x8x64xf32, #tpu.memory_space<vmem>>, vector<1x2x8x64xf32>
    %31 = vector.shape_cast %30 : vector<1x2x8x64xf32> to vector<2x8x64xf32>
    %32 = vector.shape_cast %31 : vector<2x8x64xf32> to vector<16x64xf32>
    %c0_24 = arith.constant 0 : index
    %c0_25 = arith.constant 0 : index
    %c0_26 = arith.constant 0 : index
    %33 = vector.load %arg4[%c0_24, %c0_25, %c0_26] : memref<4x64x64xf32, #tpu.memory_space<vmem>>, vector<1x64x64xf32>
    %34 = vector.shape_cast %33 : vector<1x64x64xf32> to vector<64x64xf32>
    %cst_27 = arith.constant dense<0.000000e+00> : vector<16x64xf32>
    %35 = tpu.matmul %32, %34, %cst_27 {dimension_numbers = #tpu.dot_dimension_numbers<[1], [0], [0], [1], [0, 0, 1, 1], [], []>} : vector<16x64xf32>, vector<64x64xf32>, vector<16x64xf32> -> vector<16x64xf32>
    %c1_28 = arith.constant 1 : index
    %c0_29 = arith.constant 0 : index
    %c0_30 = arith.constant 0 : index
    %c0_31 = arith.constant 0 : index
    %36 = vector.load %arg9[%c1_28, %c0_29, %c0_30, %c0_31] : memref<4x2x8x64xf32, #tpu.memory_space<vmem>>, vector<1x2x8x64xf32>
    %37 = vector.shape_cast %36 : vector<1x2x8x64xf32> to vector<2x8x64xf32>
    %38 = vector.shape_cast %37 : vector<2x8x64xf32> to vector<16x64xf32>
    %c1_32 = arith.constant 1 : index
    %c0_33 = arith.constant 0 : index
    %c0_34 = arith.constant 0 : index
    %39 = vector.load %arg4[%c1_32, %c0_33, %c0_34] : memref<4x64x64xf32, #tpu.memory_space<vmem>>, vector<1x64x64xf32>
    %40 = vector.shape_cast %39 : vector<1x64x64xf32> to vector<64x64xf32>
    %cst_35 = arith.constant dense<0.000000e+00> : vector<16x64xf32>
    %41 = tpu.matmul %38, %40, %cst_35 {dimension_numbers = #tpu.dot_dimension_numbers<[1], [0], [0], [1], [0, 0, 1, 1], [], []>} : vector<16x64xf32>, vector<64x64xf32>, vector<16x64xf32> -> vector<16x64xf32>
    %42 = arith.addf %35, %41 : vector<16x64xf32>
    %c2_36 = arith.constant 2 : index
    %c0_37 = arith.constant 0 : index
    %c0_38 = arith.constant 0 : index
    %c0_39 = arith.constant 0 : index
    %43 = vector.load %arg9[%c2_36, %c0_37, %c0_38, %c0_39] : memref<4x2x8x64xf32, #tpu.memory_space<vmem>>, vector<1x2x8x64xf32>
    %44 = vector.shape_cast %43 : vector<1x2x8x64xf32> to vector<2x8x64xf32>
    %45 = vector.shape_cast %44 : vector<2x8x64xf32> to vector<16x64xf32>
    %c2_40 = arith.constant 2 : index
    %c0_41 = arith.constant 0 : index
    %c0_42 = arith.constant 0 : index
    %46 = vector.load %arg4[%c2_40, %c0_41, %c0_42] : memref<4x64x64xf32, #tpu.memory_space<vmem>>, vector<1x64x64xf32>
    %47 = vector.shape_cast %46 : vector<1x64x64xf32> to vector<64x64xf32>
    %cst_43 = arith.constant dense<0.000000e+00> : vector<16x64xf32>
    %48 = tpu.matmul %45, %47, %cst_43 {dimension_numbers = #tpu.dot_dimension_numbers<[1], [0], [0], [1], [0, 0, 1, 1], [], []>} : vector<16x64xf32>, vector<64x64xf32>, vector<16x64xf32> -> vector<16x64xf32>
    %49 = arith.addf %42, %48 : vector<16x64xf32>
    %c3_44 = arith.constant 3 : index
    %c0_45 = arith.constant 0 : index
    %c0_46 = arith.constant 0 : index
    %c0_47 = arith.constant 0 : index
    %50 = vector.load %arg9[%c3_44, %c0_45, %c0_46, %c0_47] : memref<4x2x8x64xf32, #tpu.memory_space<vmem>>, vector<1x2x8x64xf32>
    %51 = vector.shape_cast %50 : vector<1x2x8x64xf32> to vector<2x8x64xf32>
    %52 = vector.shape_cast %51 : vector<2x8x64xf32> to vector<16x64xf32>
    %c3_48 = arith.constant 3 : index
    %c0_49 = arith.constant 0 : index
    %c0_50 = arith.constant 0 : index
    %53 = vector.load %arg4[%c3_48, %c0_49, %c0_50] : memref<4x64x64xf32, #tpu.memory_space<vmem>>, vector<1x64x64xf32>
    %54 = vector.shape_cast %53 : vector<1x64x64xf32> to vector<64x64xf32>
    %cst_51 = arith.constant dense<0.000000e+00> : vector<16x64xf32>
    %55 = tpu.matmul %52, %54, %cst_51 {dimension_numbers = #tpu.dot_dimension_numbers<[1], [0], [0], [1], [0, 0, 1, 1], [], []>} : vector<16x64xf32>, vector<64x64xf32>, vector<16x64xf32> -> vector<16x64xf32>
    %56 = arith.addf %49, %55 : vector<16x64xf32>
    %c0_52 = arith.constant 0 : index
    %c0_53 = arith.constant 0 : index
    %57 = vector.load %arg5[%c0_52, %c0_53] : memref<1x64xf32, #tpu.memory_space<vmem>>, vector<1x64xf32>
    %58 = vector.broadcast %57 : vector<1x64xf32> to vector<16x64xf32>
    %59 = arith.addf %56, %58 : vector<16x64xf32>
    %cst_54 = arith.constant 0.000000e+00 : f32
    %60 = vector.broadcast %cst_54 : f32 to vector<16x64xf32>
    %61 = arith.maximumf %59, %60 : vector<16x64xf32>
    %62 = vector.shape_cast %61 : vector<16x64xf32> to vector<2x8x64xf32>
    %c0_55 = arith.constant 0 : index
    %c0_56 = arith.constant 0 : index
    %c0_57 = arith.constant 0 : index
    %63 = vector.load %arg10[%c0_55, %c0_56, %c0_57] : memref<2x8x64xf32, #tpu.memory_space<vmem>>, vector<2x8x64xf32>
    tpu.vector_store %arg10[%c0_55, %c0_56, %c0_57], %62 {strides = array<i32>} : memref<2x8x64xf32, #tpu.memory_space<vmem>>, vector<2x8x64xf32>,
    %c0_58 = arith.constant 0 : index
    %c0_59 = arith.constant 0 : index
    %c0_60 = arith.constant 0 : index
    %64 = vector.load %arg10[%c0_58, %c0_59, %c0_60] : memref<2x8x64xf32, #tpu.memory_space<vmem>>, vector<1x8x64xf32>
    %65 = vector.shape_cast %64 : vector<1x8x64xf32> to vector<8x64xf32>
    %c0_61 = arith.constant 0 : index
    %c0_62 = arith.constant 0 : index
    %c0_63 = arith.constant 0 : index
    %66 = vector.load %arg6[%c0_61, %c0_62, %c0_63] : memref<2x64x32xf32, #tpu.memory_space<vmem>>, vector<1x64x32xf32>
    %67 = vector.shape_cast %66 : vector<1x64x32xf32> to vector<64x32xf32>
    %cst_64 = arith.constant dense<0.000000e+00> : vector<8x32xf32>
    %68 = tpu.matmul %65, %67, %cst_64 {dimension_numbers = #tpu.dot_dimension_numbers<[1], [0], [0], [1], [0, 0, 1, 1], [], []>} : vector<8x64xf32>, vector<64x32xf32>, vector<8x32xf32> -> vector<8x32xf32>
    %c1_65 = arith.constant 1 : index
    %c0_66 = arith.constant 0 : index
    %c0_67 = arith.constant 0 : index
    %69 = vector.load %arg10[%c1_65, %c0_66, %c0_67] : memref<2x8x64xf32, #tpu.memory_space<vmem>>, vector<1x8x64xf32>
    %70 = vector.shape_cast %69 : vector<1x8x64xf32> to vector<8x64xf32>
    %c1_68 = arith.constant 1 : index
    %c0_69 = arith.constant 0 : index
    %c0_70 = arith.constant 0 : index
    %71 = vector.load %arg6[%c1_68, %c0_69, %c0_70] : memref<2x64x32xf32, #tpu.memory_space<vmem>>, vector<1x64x32xf32>
    %72 = vector.shape_cast %71 : vector<1x64x32xf32> to vector<64x32xf32>
    %cst_71 = arith.constant dense<0.000000e+00> : vector<8x32xf32>
    %73 = tpu.matmul %70, %72, %cst_71 {dimension_numbers = #tpu.dot_dimension_numbers<[1], [0], [0], [1], [0, 0, 1, 1], [], []>} : vector<8x64xf32>, vector<64x32xf32>, vector<8x32xf32> -> vector<8x32xf32>
    %74 = arith.addf %68, %73 : vector<8x32xf32>
    %c0_72 = arith.constant 0 : index
    %c0_73 = arith.constant 0 : index
    %75 = vector.load %arg7[%c0_72, %c0_73] : memref<1x32xf32, #tpu.memory_space<vmem>>, vector<1x32xf32>
    %76 = vector.broadcast %75 : vector<1x32xf32> to vector<8x32xf32>
    %77 = arith.addf %74, %76 : vector<8x32xf32>
    %cst_74 = arith.constant 0.000000e+00 : f32
    %78 = vector.broadcast %cst_74 : f32 to vector<8x32xf32>
    %79 = arith.maximumf %77, %78 : vector<8x32xf32>
    %80 = vector.shape_cast %79 : vector<8x32xf32> to vector<1x8x32xf32>
    %c0_75 = arith.constant 0 : index
    %c0_76 = arith.constant 0 : index
    %c0_77 = arith.constant 0 : index
    %81 = vector.load %arg8[%c0_75, %c0_76, %c0_77] : memref<1x8x32xf32, #tpu.memory_space<vmem>>, vector<1x8x32xf32>
    tpu.vector_store %arg8[%c0_75, %c0_76, %c0_77], %80 {strides = array<i32>} : memref<1x8x32xf32, #tpu.memory_space<vmem>>, vector<1x8x32xf32>,
    return
  }
  func.func @transform_0(%arg0: i32) -> (i32, i32, i32) {
    %c0_i32 = arith.constant 0 : i32
    %c0_i32_0 = arith.constant 0 : i32
    %c0_i32_1 = arith.constant 0 : i32
    return %c0_i32, %arg0, %c0_i32_0 : i32, i32, i32
  }
  func.func @transform_1(%arg0: i32) -> (i32, i32) {
    %c0_i32 = arith.constant 0 : i32
    %c0_i32_0 = arith.constant 0 : i32
    %c0_i32_1 = arith.constant 0 : i32
    return %c0_i32, %c0_i32_0 : i32, i32
  }
  func.func @transform_2(%arg0: i32) -> (i32, i32) {
    %c0_i32 = arith.constant 0 : i32
    %c0_i32_0 = arith.constant 0 : i32
    %c0_i32_1 = arith.constant 0 : i32
    return %c0_i32, %c0_i32_0 : i32, i32
  }
  func.func @transform_3(%arg0: i32) -> (i32, i32, i32) {
    %c0_i32 = arith.constant 0 : i32
    %c0_i32_0 = arith.constant 0 : i32
    %c0_i32_1 = arith.constant 0 : i32
    %c0_i32_2 = arith.constant 0 : i32
    return %c0_i32, %c0_i32_0, %c0_i32_1 : i32, i32, i32
  }
  func.func @transform_4(%arg0: i32) -> (i32, i32) {
    %c0_i32 = arith.constant 0 : i32
    %c0_i32_0 = arith.constant 0 : i32
    %c0_i32_1 = arith.constant 0 : i32
    return %c0_i32, %c0_i32_0 : i32, i32
  }
  func.func @transform_5(%arg0: i32) -> (i32, i32, i32) {
    %c0_i32 = arith.constant 0 : i32
    %c0_i32_0 = arith.constant 0 : i32
    %c0_i32_1 = arith.constant 0 : i32
    %c0_i32_2 = arith.constant 0 : i32
    return %c0_i32, %c0_i32_0, %c0_i32_1 : i32, i32, i32
  }
  func.func @transform_6(%arg0: i32) -> (i32, i32) {
    %c0_i32 = arith.constant 0 : i32
    %c0_i32_0 = arith.constant 0 : i32
    %c0_i32_1 = arith.constant 0 : i32
    return %c0_i32, %c0_i32_0 : i32, i32
  }
  func.func @transform_7(%arg0: i32) -> (i32, i32, i32) {
    %c0_i32 = arith.constant 0 : i32
    %c0_i32_0 = arith.constant 0 : i32
    %c0_i32_1 = arith.constant 0 : i32
    return %c0_i32, %arg0, %c0_i32_0 : i32, i32, i32
  }
}

</mosaic_0001>

<bundles_post_ra>
// kernel: tpu_custom_call.1
= control target key start
LH: loop header
LB: loop body
LE: loop exit
PB: predicated region body
PF: predicated region fallthrough
CT: control target
= control target key end

     0   :  { %12 = vsyncpa [#allocation5], 0  ;;  %s1269_s0 = inlined_call_operand.vmem [shape: f32[8,8,64], index: 0, kind: input, shape index: {}]   ;;  %s1270_s1 = inlined_call_operand.vmem [shape: f32[64,64], index: 1, kind: input, shape index: {}]   ;;  %s1271_s2 = inlined_call_operand.vmem [shape: f32[1,64], index: 2, kind: input, shape index: {}]   ;;  %s1272_s3 = inlined_call_operand.hbm [shape: f32[4,64,64], index: 3, kind: input, shape index: {}]   ;;  %s1273_s4 = inlined_call_operand.vmem [shape: f32[1,64], index: 4, kind: input, shape index: {}]   ;;  %s1274_s5 = inlined_call_operand.vmem [shape: f32[2,64,32], index: 5, kind: input, shape index: {}]   ;;  %s1275_s6 = inlined_call_operand.vmem [shape: f32[1,32], index: 6, kind: input, shape index: {}]   ;;  %s1276_s7 = inlined_call_operand.hbm [shape: f32[1,8,32], index: 7, kind: output, shape index: {}]  }
   0x1   :  { %13 = vsyncpa [#allocation6], 0  ;;  %s1084_s24 = smov [#allocation4]  }
   0x2   :  { %s25_s25 = sshll.u32 %s1084_s24, 4  ;;  %s26_s25 = int_to_ptr.vmem [resolvable:$true] %s25_s25 }
   0x3   :  { %s1048_s26 = scalar_lea.vmem %s26_s25, 4096  ;;  %p1053_p1 = scmp.lt.s32.totalorder %s26_s25, %s26_s25 }
   0x4   :  { %p1049_p0 = scmp.ne.s32.totalorder %s26_s25, %s1048_s26  ;;  %p1054_p2 = scmp.lt.s32.totalorder %s1048_s26, %s1048_s26 }
   0x6   :  { %p1055_p3 = por %p1054_p2, %p1053_p1 }
   0x8   :  { %p1056_p4 = pnand %p1055_p3, %p1049_p0 }
   0xa   :  { %1059 = shalt.err (!%p1056_p4)
}
   0xb   :  { %s1085_s27 = smov 128   ;;  %s1086_s28 = smov 8  }
   0xc   :  { %31 = dma.hbm_to_vmem [thread:$0]  %s1272_s3, 4096, %s26_s25, [#allocation5], %s1085_s27, %s1085_s27, %s1086_s28  }
   0xd   :  { %1080 = dma.done.wait [#allocation5], 4096  }
   0xe   :  { %1081 = vsyncadd [#allocation5], 4294963200  ;;  %v56_v0 = vld [vmem:[%s1270_s1 + $0x38] sm:$0xff]  ;;  %v55_v1 = vld [vmem:[%s1270_s1 + $0x30] sm:$0xff]  ;;  %vm64_vm0 = vcmask 523264   ;;  %vm1088_vm1 = vmmov 0  }
   0xf   :  { %892 = vmatprep.subr.mxu0 %v56_v0  ;;  %v54_v2 = vld [vmem:[%s1270_s1 + $0x28] sm:$0xff]  ;;  %v41_v3 = vld [vmem:[%s1269_s0] sm:$0xff]  ;;  %v52_v5 = vld [vmem:[%s1270_s1 + $0x18] sm:$0xff]  ;;  %s1089_s21 = smov [#allocation7]   ;;  %vm772_vm2 = vcmask 261120  }
  0x10   :  { %893 = vmatpush3.msra.mxu0 %v56_v0  ;;  %908 = vmatprep.mubr.msk.f32.mxu0 %vm64_vm0, %v41_v3  ;;  %v53_v4 = vld [vmem:[%s1270_s1 + $0x20] sm:$0xff]  ;;  %v51_v6 = vld [vmem:[%s1270_s1 + $0x10] sm:$0xff]  ;;  %v50_v7 = vld [vmem:[%s1270_s1 + $0x8] sm:$0xff]  ;;  %s780_s22 = sshll.u32 %s1089_s21, 4  ;;  %s781_s22 = int_to_ptr.vmem [resolvable:$true] %s780_s22 }
  0x11   :  { %894 = vmatprep.subr.mxu0 %v55_v1  ;;  %v49_v8 = vld [vmem:[%s1270_s1] sm:$0xff]  ;;  %v42_v9 = vld [vmem:[%s1269_s0 + $0x8] sm:$0xff]  ;;  %v43_v10 = vld [vmem:[%s1269_s0 + $0x10] sm:$0xff]  ;;  %s1060_s23 = scalar_lea.vmem %s781_s22, 128  ;;  %p1065_p6 = scmp.lt.s32.totalorder %s781_s22, %s781_s22 }
  0x12   :  { %895 = vmatpush3.msra.mxu0 %v55_v1  ;;  %v44_v11 = vld [vmem:[%s1269_s0 + $0x18] sm:$0xff]  ;;  %v45_v12 = vld [vmem:[%s1269_s0 + $0x20] sm:$0xff]  ;;  %v46_v13 = vld [vmem:[%s1269_s0 + $0x28] sm:$0xff]  ;;  %p1061_p5 = scmp.ne.s32.totalorder %s781_s22, %s1060_s23  ;;  %p1066_p7 = scmp.lt.s32.totalorder %s1060_s23, %s1060_s23 }
  0x13   :  { %896 = vmatprep.subr.mxu0 %v54_v2  ;;  %v47_v14 = vld [vmem:[%s1269_s0 + $0x30] sm:$0xff]  ;;  %v48_v15 = vld [vmem:[%s1269_s0 + $0x38] sm:$0xff]  ;;  %v233_v16 = vld [vmem:[#allocation4 + $0x78] sm:$0xff] }
  0x14   :  { %897 = vmatpush3.msra.mxu0 %v54_v2  ;;  %920 = vmatprep.subr.mxu1 %v233_v16  ;;  %v232_v17 = vld [vmem:[#allocation4 + $0x70] sm:$0xff]  ;;  %v222_v18 = vld [vmem:[#allocation4 + $0x38] sm:$0xff]  ;;  %v231_v19 = vld [vmem:[#allocation4 + $0x68] sm:$0xff]  ;;  %p1067_p8 = por %p1066_p7, %p1065_p6 }
  0x15   :  { %898 = vmatprep.subr.mxu0 %v53_v4  ;;  %921 = vmatpush3.msra.mxu1 %v233_v16  ;;  %v221_v20 = vld [vmem:[#allocation4 + $0x30] sm:$0xff]  ;;  %v230_v21 = vld [vmem:[#allocation4 + $0x60] sm:$0xff]  ;;  %v220_v22 = vld [vmem:[#allocation4 + $0x28] sm:$0xff] }
  0x16   :  { %899 = vmatpush3.msra.mxu0 %v53_v4  ;;  %922 = vmatprep.subr.mxu1 %v232_v17  ;;  %v229_v23 = vld [vmem:[#allocation4 + $0x58] sm:$0xff]  ;;  %v219_v24 = vld [vmem:[#allocation4 + $0x20] sm:$0xff]  ;;  %v228_v25 = vld [vmem:[#allocation4 + $0x50] sm:$0xff]  ;;  %p1068_p9 = pnand %p1067_p8, %p1061_p5 }
  0x17   :  { %900 = vmatprep.subr.mxu0 %v52_v5  ;;  %923 = vmatpush3.msra.mxu1 %v232_v17  ;;  %v218_v26 = vld [vmem:[#allocation4 + $0x18] sm:$0xff]  ;;  %v227_v27 = vld [vmem:[#allocation4 + $0x48] sm:$0xff]  ;;  %v217_v28 = vld [vmem:[#allocation4 + $0x10] sm:$0xff]  ;;  %v1087_v17 = vmov 0.0  }
  0x18   :  { %901 = vmatpush3.msra.mxu0 %v52_v5  ;;  %924 = vmatprep.subr.mxu1 %v231_v19  ;;  %v226_v29 = vld [vmem:[#allocation4 + $0x40] sm:$0xff]  ;;  %v216_v30 = vld [vmem:[#allocation4 + $0x8] sm:$0xff]  ;;  %v406_v32 = vld [vmem:[#allocation4 + $0xb8] sm:$0xff] }
  0x19   :  { %902 = vmatprep.subr.mxu0 %v51_v6  ;;  %925 = vmatpush3.msra.mxu1 %v231_v19  ;;  %v215_v31 = vld [vmem:[#allocation4] sm:$0xff]  ;;  %v500_v33 = vld [vmem:[#allocation4 + $0xf8] sm:$0xff]  ;;  %v789_v34 = vld [vmem:[%s1271_s2] ss:$0 sm:$0xff] }
  0x1a   :  { %903 = vmatpush3.msra.mxu0 %v51_v6  ;;  %926 = vmatprep.subr.mxu1 %v230_v21  ;;  %v405_v62 = vld [vmem:[#allocation4 + $0xb0] sm:$0xff]  ;;  %v404_v1 = vld [vmem:[#allocation4 + $0xa8] sm:$0xff]  ;;  %v403_v3 = vld [vmem:[#allocation4 + $0xa0] sm:$0xff] }
  0x1b   :  { %904 = vmatprep.subr.mxu0 %v50_v7  ;;  %927 = vmatpush3.msra.mxu1 %v230_v21  ;;  %v499_v2 = vld [vmem:[#allocation4 + $0xf0] sm:$0xff]  ;;  %v498_v5 = vld [vmem:[#allocation4 + $0xe8] sm:$0xff]  ;;  %v402_v6 = vld [vmem:[#allocation4 + $0x98] sm:$0xff] }
  0x1c   :  { %905 = vmatpush3.msra.mxu0 %v50_v7  ;;  %928 = vmatprep.subr.mxu1 %v229_v23  ;;  %v497_v7 = vld [vmem:[#allocation4 + $0xe0] sm:$0xff]  ;;  %v812_v21 = vld [vmem:[%s1274_s5 + $0x68] sm:$0xff] }
  0x1d   :  { %906 = vmatprep.subr.mxu0 %v49_v8  ;;  %929 = vmatpush3.msra.mxu1 %v229_v23  ;;  %v813_v19 = vld [vmem:[%s1274_s5 + $0x70] sm:$0xff]  ;;  %v811_v23 = vld [vmem:[%s1274_s5 + $0x60] sm:$0xff] }
  0x1e   :  { %907 = vmatpush3.msra.mxu0 %v49_v8  ;;  %930 = vmatprep.subr.mxu1 %v228_v25  ;;  %v401_v8 = vld [vmem:[#allocation4 + $0x90] sm:$0xff] }
  0x1f   :  { %909 = vmatmul.mubr.msk.f32.vlgmr.msra.gmra.mxu0 %vm64_vm0, %v42_v9  ;;  %939 = vmatprep.subr.mxu0 %v222_v18  ;;  %v496_v9 = vld [vmem:[#allocation4 + $0xd8] sm:$0xff] }
  0x20   :  { %911 = vmatprep.mubr.msk.f32.mxu0 %vm64_vm0, %v43_v10  ;;  %940 = vmatpush3.msra.mxu0 %v222_v18  ;;  %v400_v10 = vld [vmem:[#allocation4 + $0x88] sm:$0xff] }
  0x21   :  { %941 = vmatprep.subr.mxu0 %v221_v20  ;;  %931 = vmatpush3.msra.mxu1 %v228_v25  ;;  %v814_v18 = vld [vmem:[%s1274_s5 + $0x78] sm:$0xff] }
  0x22   :  { %942 = vmatpush3.msra.mxu0 %v221_v20  ;;  %932 = vmatprep.subr.mxu1 %v227_v27  ;;  %v605_v20 = vld [vmem:[%s1274_s5 + $0x38] sm:$0xff] }
  0x23   :  { %912 = vmatmul.mubr.msk.f32.gmra.mxu0 %vm64_vm0, %v44_v11  ;;  %943 = vmatprep.subr.mxu0 %v220_v22  ;;  %v495_v11 = vld [vmem:[#allocation4 + $0xd0] sm:$0xff]  ;;  %v810_v25 = vld [vmem:[%s1274_s5 + $0x58] sm:$0xff] }
  0x24   :  { %914 = vmatprep.mubr.msk.f32.mxu0 %vm64_vm0, %v45_v12  ;;  %944 = vmatpush3.msra.mxu0 %v220_v22  ;;  %v399_v12 = vld [vmem:[#allocation4 + $0x80] sm:$0xff] }
  0x25   :  { %945 = vmatprep.subr.mxu0 %v219_v24  ;;  %933 = vmatpush3.msra.mxu1 %v227_v27  ;;  %v604_v22 = vld [vmem:[%s1274_s5 + $0x30] sm:$0xff] }
  0x26   :  { %946 = vmatpush3.msra.mxu0 %v219_v24  ;;  %934 = vmatprep.subr.mxu1 %v226_v29  ;;  %v603_v24 = vld [vmem:[%s1274_s5 + $0x28] sm:$0xff]  ;;  %v809_v27 = vld [vmem:[%s1274_s5 + $0x50] sm:$0xff] }
  0x27   :  { %915 = vmatmul.mubr.msk.f32.gmra.mxu0 %vm64_vm0, %v46_v13  ;;  %947 = vmatprep.subr.mxu0 %v218_v26  ;;  %v494_v13 = vld [vmem:[#allocation4 + $0xc8] sm:$0xff] }
  0x28   :  { %917 = vmatprep.mubr.msk.f32.mxu0 %vm64_vm0, %v47_v14  ;;  %948 = vmatpush3.msra.mxu0 %v218_v26  ;;  %v493_v14 = vld [vmem:[#allocation4 + $0xc0] sm:$0xff]  ;;  %v602_v26 = vld [vmem:[%s1274_s5 + $0x20] sm:$0xff] }
  0x29   :  { %949 = vmatprep.subr.mxu0 %v217_v28  ;;  %935 = vmatpush3.msra.mxu1 %v226_v29  ;;  %v808_v29 = vld [vmem:[%s1274_s5 + $0x48] sm:$0xff] }
  0x2a   :  { %950 = vmatpush3.msra.mxu0 %v217_v28  ;;  %958 = vmatprep.subr.mxu1 %v406_v32  ;;  %v601_v28 = vld [vmem:[%s1274_s5 + $0x18] sm:$0xff] }
  0x2b   :  { %918 = vmatmul.mubr.msk.f32.gmra.mxu0 %vm64_vm0, %v48_v15  ;;  %951 = vmatprep.subr.mxu0 %v216_v30 }
  0x2c   :  { %952 = vmatpush3.msra.mxu0 %v216_v30  ;;  %v600_v30 = vld [vmem:[%s1274_s5 + $0x10] sm:$0xff] }
  0x2d   :  { %953 = vmatprep.subr.mxu0 %v215_v31 }
  0x2e   :  { %954 = vmatpush3.msra.mxu0 %v215_v31  ;;  %v807_v31 = vld [vmem:[%s1274_s5 + $0x40] sm:$0xff] }
  0x2f   :  { %977 = vmatprep.subr.mxu0 %v500_v33 }
  0xdf   :  { %v910_v35 = vpop.f32.mrf.mxu0 }
  0xe0   :  { %v161_v36 = vadd.f32 %v910_v35, %v789_v34 }
  0xe1   :  { %v155_v37 = vpop.f32.mrf.mxu0 }
  0xe2   :  { %v195_v38 = vmax.f32 %v161_v36, 0.0  ;;  %v156_v39 = vadd.f32 %v789_v34, %v155_v37 }
  0xe3   :  { %v913_v40 = vpop.f32.mrf.mxu0 }
  0xe4   :  { %205 = vst.msk [vmem:[#allocation2 + $0x10] sm:$0xff] %vm64_vm0, %v195_v38  ;;  %v194_v41 = vmax.f32 %v156_v39, 0.0  ;;  %v171_v42 = vadd.f32 %v913_v40, %v789_v34 }
  0xe5   :  { %v165_v43 = vpop.f32.mrf.mxu0 }
  0xe6   :  { %202 = vst.msk [vmem:[#allocation2] sm:$0xff] %vm64_vm0, %v194_v41  ;;  %v197_v44 = vmax.f32 %v171_v42, 0.0  ;;  %v166_v45 = vadd.f32 %v789_v34, %v165_v43 }
  0xe7   :  { %v916_v46 = vpop.f32.mrf.mxu0 }
  0xe8   :  { %211 = vst.msk [vmem:[#allocation2 + $0x30] sm:$0xff] %vm64_vm0, %v197_v44  ;;  %v196_v47 = vmax.f32 %v166_v45, 0.0  ;;  %v181_v48 = vadd.f32 %v916_v46, %v789_v34  ;;  %v806_v45 = vld [vmem:[%s1273_s4] ss:$0 sm:$0xff] }
  0xe9   :  { %v175_v49 = vpop.f32.mrf.mxu0 }
  0xea   :  { %208 = vst.msk [vmem:[#allocation2 + $0x20] sm:$0xff] %vm64_vm0, %v196_v47  ;;  %v199_v50 = vmax.f32 %v181_v48, 0.0  ;;  %v176_v51 = vadd.f32 %v789_v34, %v175_v49 }
  0xeb   :  { %v223_v52 = vld [vmem:[#allocation2 + $0x10] sm:$0xff]  ;;  %v919_v53 = vpop.f32.mrf.mxu0 }
  0xec   :  { %206 = vst.msk [vmem:[#allocation2 + $0x18] sm:$0xff] %vm64_vm0, %v199_v50  ;;  %v198_v54 = vmax.f32 %v176_v51, 0.0  ;;  %936 = vmatprep.mubr.msk.f32.mxu1 %vm64_vm0, %v223_v52  ;;  %v191_v55 = vadd.f32 %v919_v53, %v789_v34 }
  0xed   :  { %v213_v56 = vld [vmem:[#allocation2] sm:$0xff]  ;;  %v185_v57 = vpop.f32.mrf.mxu0 }
  0xee   :  { %203 = vst.msk [vmem:[#allocation2 + $0x8] sm:$0xff] %vm64_vm0, %v198_v54  ;;  %955 = vmatprep.mubr.msk.f32.mxu0 %vm64_vm0, %v213_v56  ;;  %v201_v58 = vmax.f32 %v191_v55, 0.0  ;;  %v186_v59 = vadd.f32 %v789_v34, %v185_v57 }
  0xef   :  { %v490_v4 = vld [vmem:[#allocation2 + $0x30] sm:$0xff] }
  0xf0   :  { %212 = vst.msk [vmem:[#allocation2 + $0x38] sm:$0xff] %vm64_vm0, %v201_v58  ;;  %v200_v60 = vmax.f32 %v186_v59, 0.0  ;;  %v817_v58 = vld [vmem:[%s1275_s6] ss:$0 sm:$0xff] }
  0xf1   :  { %v396_v63 = vld [vmem:[#allocation2 + $0x20] sm:$0xff] }
  0xf2   :  { %209 = vst.msk [vmem:[#allocation2 + $0x28] sm:$0xff] %vm64_vm0, %v200_v60 }
  0xf3   :  { %v224_v61 = vld [vmem:[#allocation2 + $0x18] sm:$0xff] }
  0xf4   :  { %937 = vmatmul.mubr.msk.f32.vlgmr.msra.gmra.mxu1 %vm64_vm0, %v224_v61 }
  0xf5   :  { %959 = vmatpush3.msra.mxu1 %v406_v32  ;;  %974 = vmatprep.mubr.msk.f32.mxu1 %vm64_vm0, %v396_v63  ;;  %v214_v0 = vld [vmem:[#allocation2 + $0x8] sm:$0xff] }
  0xf6   :  { %960 = vmatprep.subr.mxu1 %v405_v62  ;;  %956 = vmatmul.mubr.msk.f32.vlgmr.msra.gmra.mxu0 %vm64_vm0, %v214_v0  ;;  %v599_v32 = vld [vmem:[%s1274_s5 + $0x8] sm:$0xff] }
  0xf7   :  { %961 = vmatpush3.msra.mxu1 %v405_v62  ;;  %978 = vmatpush3.msra.mxu0 %v500_v33  ;;  %v491_v16 = vld [vmem:[#allocation2 + $0x38] sm:$0xff]  ;;  %v598_v33 = vld [vmem:[%s1274_s5] sm:$0xff] }
  0xf8   :  { %962 = vmatprep.subr.mxu1 %v404_v1  ;;  %979 = vmatprep.subr.mxu0 %v499_v2 }
  0xf9   :  { %993 = vmatprep.mubr.msk.f32.mxu0 %vm64_vm0, %v490_v4  ;;  %963 = vmatpush3.msra.mxu1 %v404_v1  ;;  %v397_v15 = vld [vmem:[#allocation2 + $0x28] sm:$0xff] }
  0xfa   :  { %980 = vmatpush3.msra.mxu0 %v499_v2  ;;  %964 = vmatprep.subr.mxu1 %v403_v3 }
  0xfb   :  { %981 = vmatprep.subr.mxu0 %v498_v5  ;;  %965 = vmatpush3.msra.mxu1 %v403_v3 }
  0xfc   :  { %982 = vmatpush3.msra.mxu0 %v498_v5  ;;  %966 = vmatprep.subr.mxu1 %v402_v6 }
  0xfd   :  { %983 = vmatprep.subr.mxu0 %v497_v7  ;;  %967 = vmatpush3.msra.mxu1 %v402_v6 }
  0xfe   :  { %984 = vmatpush3.msra.mxu0 %v497_v7  ;;  %968 = vmatprep.subr.mxu1 %v401_v8 }
  0xff   :  { %985 = vmatprep.subr.mxu0 %v496_v9  ;;  %969 = vmatpush3.msra.mxu1 %v401_v8 }
 0x100   :  { %986 = vmatpush3.msra.mxu0 %v496_v9  ;;  %970 = vmatprep.subr.mxu1 %v400_v10 }
 0x101   :  { %987 = vmatprep.subr.mxu0 %v495_v11  ;;  %971 = vmatpush3.msra.mxu1 %v400_v10 }
 0x102   :  { %988 = vmatpush3.msra.mxu0 %v495_v11  ;;  %972 = vmatprep.subr.mxu1 %v399_v12 }
 0x103   :  { %989 = vmatprep.subr.mxu0 %v494_v13  ;;  %973 = vmatpush3.msra.mxu1 %v399_v12 }
 0x104   :  { %990 = vmatpush3.msra.mxu0 %v494_v13  ;;  %975 = vmatmul.mubr.msk.f32.vlgmr.msra.gmra.mxu1 %vm64_vm0, %v397_v15 }
 0x105   :  { %991 = vmatprep.subr.mxu0 %v493_v14  ;;  %996 = vmatprep.subr.mxu1 %v1087_v17 }
 0x106   :  { %992 = vmatpush3.msra.mxu0 %v493_v14  ;;  %997 = vmatpush3.msra.mxu1 %v814_v18 }
 0x107   :  { %994 = vmatmul.mubr.msk.f32.vlgmr.msra.gmra.mxu0 %vm64_vm0, %v491_v16  ;;  %1015 = vmatprep.subr.mxu0 %v1087_v17 }
 0x108   :  { %998 = vmatprep.subr.mxu1 %v1087_v17  ;;  %1016 = vmatpush3.msra.mxu0 %v605_v20 }
 0x109   :  { %999 = vmatpush3.msra.mxu1 %v813_v19  ;;  %1017 = vmatprep.subr.mxu0 %v1087_v17 }
 0x10a   :  { %1000 = vmatprep.subr.mxu1 %v1087_v17  ;;  %1018 = vmatpush3.msra.mxu0 %v604_v22 }
 0x10b   :  { %1001 = vmatpush3.msra.mxu1 %v812_v21  ;;  %1019 = vmatprep.subr.mxu0 %v1087_v17 }
 0x10c   :  { %1002 = vmatprep.subr.mxu1 %v1087_v17  ;;  %1020 = vmatpush3.msra.mxu0 %v603_v24 }
 0x10d   :  { %1003 = vmatpush3.msra.mxu1 %v811_v23  ;;  %1021 = vmatprep.subr.mxu0 %v1087_v17 }
 0x10e   :  { %1004 = vmatprep.subr.mxu1 %v1087_v17  ;;  %1022 = vmatpush3.msra.mxu0 %v602_v26 }
 0x10f   :  { %1005 = vmatpush3.msra.mxu1 %v810_v25  ;;  %1023 = vmatprep.subr.mxu0 %v1087_v17 }
 0x110   :  { %1006 = vmatprep.subr.mxu1 %v1087_v17  ;;  %1024 = vmatpush3.msra.mxu0 %v601_v28 }
 0x111   :  { %1007 = vmatpush3.msra.mxu1 %v809_v27  ;;  %1025 = vmatprep.subr.mxu0 %v1087_v17 }
 0x112   :  { %1008 = vmatprep.subr.mxu1 %v1087_v17  ;;  %1026 = vmatpush3.msra.mxu0 %v600_v30 }
 0x113   :  { %1009 = vmatpush3.msra.mxu1 %v808_v29  ;;  %1027 = vmatprep.subr.mxu0 %v1087_v17 }
 0x114   :  { %1010 = vmatprep.subr.mxu1 %v1087_v17  ;;  %1012 = vmatprep.mubr.msk.f32.mxu1 %vm1088_vm1, %v1087_v17 }
 0x115   :  { %1011 = vmatpush3.msra.mxu1 %v807_v31  ;;  %1028 = vmatpush3.msra.mxu0 %v599_v32 }
 0x116   :  { %1031 = vmatprep.mubr.msk.f32.mxu0 %vm1088_vm1, %v1087_v17  ;;  %1029 = vmatprep.subr.mxu0 %v1087_v17 }
 0x117   :  { %1030 = vmatpush3.msra.mxu0 %v598_v33 }
 0x1b4   :  { %v938_v34 = vpop.f32.mrf.mxu1 }
 0x1b6   :  { %v957_v35 = vpop.f32.mrf.mxu0  ;;  %v306_v36 = vpop.f32.mrf.mxu1 }
 0x1b7   :  { %v393_v38 = vadd.f32 %v957_v35, %v938_v34 }
 0x1b8   :  { %v387_v37 = vpop.f32.mrf.mxu0 }
 0x1b9   :  { %v388_v40 = vadd.f32 %v387_v37, %v306_v36 }
 0x1c4   :  { %v976_v39 = vpop.f32.mrf.mxu1 }
 0x1c5   :  { %v489_v41 = vadd.f32 %v976_v39, %v393_v38 }
 0x1c6   :  { %v479_v42 = vpop.f32.mrf.mxu1 }
 0x1c7   :  { %v488_v43 = vadd.f32 %v479_v42, %v388_v40  ;;  %v995_v44 = vpop.f32.mrf.mxu0 }
 0x1c8   :  { %v583_v46 = vadd.f32 %v995_v44, %v489_v41 }
 0x1c9   :  { %v573_v47 = vpop.f32.mrf.mxu0 }
 0x1ca   :  { %v592_v48 = vadd.f32 %v806_v45, %v583_v46  ;;  %v582_v49 = vadd.f32 %v573_v47, %v488_v43 }
 0x1cc   :  { %v594_v50 = vmax.f32 %v592_v48, 0.0  ;;  %v591_v51 = vadd.f32 %v806_v45, %v582_v49 }
 0x1ce   :  { %596 = vst.msk [vmem:[#allocation3 + $0x8] sm:$0xff] %vm64_vm0, %v594_v50  ;;  %v593_v52 = vmax.f32 %v591_v51, 0.0 }
 0x1d0   :  { %595 = vst.msk [vmem:[#allocation3] sm:$0xff] %vm64_vm0, %v593_v52 }
 0x1d5   :  { %v607_v53 = vld [vmem:[#allocation3 + $0x8] sm:$0xff] }
 0x1d6   :  { %1013 = vmatmul.mubr.msk.f32.vlgmr.msra.gmra.mxu1 %vm64_vm0, %v607_v53 }
 0x1d7   :  { %v597_v54 = vld [vmem:[#allocation3] sm:$0xff] }
 0x1d8   :  { %1032 = vmatmul.mubr.msk.f32.vlgmr.msra.gmra.mxu0 %vm64_vm0, %v597_v54 }
 0x296   :  { %v686_v55 = vpop.f32.mrf.mxu1 }
 0x298   :  { %v1014_v56 = vpop.f32.mrf.mxu1  ;;  %v759_v57 = vpop.f32.mrf.mxu0 }
 0x299   :  { %v760_v59 = vadd.f32 %v759_v57, %v686_v55 }
 0x29a   :  { %v1033_v60 = vpop.f32.mrf.mxu0 }
 0x29b   :  { %v770_v61 = vadd.f32 %v817_v58, %v760_v59 }
 0x29d   :  { %v771_v62 = vmax.f32 %v770_v61, 0.0 }
 0x29f   :  { %773 = vst.msk [vmem:[#allocation7] sm:$0xff] %vm772_vm2, %v771_v62 }
 0x2a0   :  { %1071 = shalt.err (!%p1068_p9)
}
 0x2a1   :  { %783 = dma.vmem_to_hbm [thread:$0]  %s781_s22, 128, %s1276_s7, [#allocation6]  }
 0x2a2   :  { %1082 = dma.done.wait [#allocation6], 128  }
 0x2a3   :  { %1083 = vsyncadd [#allocation6], 4294967168 }
 0x2a4   :  { %787 = vsyncpa [#allocation5], 1 }
 0x2a5   :  { %788 = vsyncpa [#allocation6], 1 }

</bundles_post_ra>
